<compile_context>
chip_gen: v7x
topology: tpu7x:2x2x1
jax: 0.10.0
libtpu: 0.0.40
codegen_flags: <defaults>
</compile_context>

<pallas_src>
import jax
import jax.numpy as jnp
from jax import lax
from jax.experimental import pallas as pl
from jax.experimental.pallas import tpu as pltpu

_LANES = 128
_SUB = 8
_CHUNK_ROWS = 128  # rows per in-kernel sub-chunk (16 f32 vregs per temp array)


def _cdiv(a, b):
    return -(-a // b)


def _vmem_capacity_bytes():
    try:
        return int(pltpu.get_tpu_info().vmem_capacity_bytes)
    except Exception:
        return 64 << 20  # conservative default (v7x per-TC VMEM)


def _num_tensorcores():
    """2 TensorCores per chip on v7x; single TC on v5e/v6e (and unknown)."""
    try:
        kind = jax.devices()[0].device_kind.lower()
    except Exception:
        return 1
    return 2 if ("v7" in kind or "7x" in kind) else 1


def _make_kldiv_kernel(rows_per_tile, chunk_rows, tiles_per_split, rows_host,
                       needs_mask):
    n_chunks = rows_per_tile // chunk_rows

    def kernel(x_ref, t_ref, acc_ref):
        i = pl.program_id(1)  # inner ("arbitrary") reduction axis

        @pl.when(i == 0)
        def _():
            acc_ref[...] = jnp.zeros_like(acc_ref)

        # Nominal (un-clamped) first row of this tile; used only for masking.
        tile_row0 = (pl.program_id(0) * tiles_per_split + i) * rows_per_tile
        if needs_mask:
            row_iota = lax.broadcasted_iota(jnp.int32, (chunk_rows, _LANES), 0)

        def body(c, acc):
            r0 = pl.multiple_of(c * chunk_rows, chunk_rows)
            # Stream native dtype (e.g. bf16) from HBM, upcast in-register.
            x = x_ref[pl.ds(r0, chunk_rows), :].astype(jnp.float32)
            t = t_ref[pl.ds(r0, chunk_rows), :].astype(jnp.float32)

            valid = t > 0.0  # PyTorch kl_div xlogy semantics: t<=0 contributes 0.
            if needs_mask:
                rows = (tile_row0 + r0) + row_iota
                valid = jnp.logical_and(valid, rows < rows_host)

            # Guard log args so no NaN/Inf is ever materialized (t<=0, garbage
            # boundary rows, duplicated clamped tiles all select 0 below anyway).
            safe_t = jnp.where(valid, t, jnp.float32(1.0))
            safe_x = jnp.where(valid, x, jnp.float32(1.0))
            pw = jnp.where(valid,
                           safe_t * (jnp.log(safe_t) - jnp.log(safe_x)),
                           jnp.float32(0.0))
            # Fold the chunk into one (8,128) vreg via VPU-only adds (no XLU).
            return acc + pw.reshape(-1, _SUB, _LANES).sum(axis=0)

        tile_acc = lax.fori_loop(0, n_chunks, body,
                                 jnp.zeros((_SUB, _LANES), jnp.float32))
        acc_ref[...] += tile_acc

    return kernel


def kldiv_loss(inp, target, *, target_tile_bytes=None, split=None):
    """Pallas equivalent of KLDivLoss.forward(input, target)."""
    assert inp.shape == target.shape and inp.ndim >= 1
    B = inp.shape[0]
    N = int(inp.size)
    itemsize = jnp.dtype(inp.dtype).itemsize

    vmem_cap = _vmem_capacity_bytes()
    if target_tile_bytes is None:
        # ~VMEM/8 per input block: 16 MiB on v5e/v6e (128 MiB VMEM), 8 MiB on v7x.
        target_tile_bytes = min(max(vmem_cap // 8, 2 << 20), 16 << 20)
    if split is None:
        split = _num_tensorcores()

    x = inp.reshape(-1)
    t = target.reshape(-1)

    # Lane-dense (rows, 128) presentation.  Pad ONLY the sub-128 tail (or tiny
    # inputs) — padding: x=1 (log->0), t=0 (masked) — zero-copy otherwise.
    rows_needed = _cdiv(N, _LANES)
    rows_host = max(rows_needed, _SUB)
    padded_n = rows_host * _LANES
    if padded_n != N:
        x = jnp.concatenate([x, jnp.ones((padded_n - N,), x.dtype)])
        t = jnp.concatenate([t, jnp.zeros((padded_n - N,), t.dtype)])
    x2 = x.reshape(rows_host, _LANES)
    t2 = t.reshape(rows_host, _LANES)

    # ---- tiling ------------------------------------------------------------
    max_rows_per_tile = max(
        _SUB, (target_tile_bytes // (_LANES * itemsize)) // _SUB * _SUB)
    rows_per_tile = min(max_rows_per_tile, max(_SUB, rows_host // _SUB * _SUB))
    if rows_per_tile >= _CHUNK_ROWS:
        chunk_rows = _CHUNK_ROWS
        rows_per_tile = rows_per_tile // _CHUNK_ROWS * _CHUNK_ROWS
    else:
        chunk_rows = rows_per_tile

    total_tiles = _cdiv(rows_host, rows_per_tile)
    split = max(1, min(split, total_tiles))
    tiles_per_split = _cdiv(total_tiles, split)
    # Masking only needed when the grid nominally covers more rows than exist
    # (ragged last tile and/or duplicated clamped tiles from the split round-up).
    needs_mask = (split * tiles_per_split * rows_per_tile) != rows_host

    tile_bytes = rows_per_tile * _LANES * itemsize
    # 2 inputs x 2 pipeline buffers + slack; capped under physical VMEM.
    vmem_limit = max(32 << 20, 4 * tile_bytes + (8 << 20))
    vmem_limit = min(vmem_limit, max(vmem_cap - (16 << 20), 32 << 20))

    last_tile = total_tiles - 1

    def in_index(c, i):
        # Clamp so no block is ever fully out of bounds; over-counted tiles are
        # zeroed in-kernel by the row mask.
        return (jnp.minimum(c * tiles_per_split + i, last_tile), 0)

    kernel = _make_kldiv_kernel(rows_per_tile, chunk_rows, tiles_per_split,
                                rows_host, needs_mask)

    cost = pl.CostEstimate(
        flops=8 * N,
        transcendentals=2 * N,
        bytes_accessed=2 * N * itemsize + split * _SUB * _LANES * 4,
    )

    partials = pl.pallas_call(
        kernel,
        out_shape=jax.ShapeDtypeStruct((split, _SUB, _LANES), jnp.float32),
        grid_spec=pltpu.PrefetchScalarGridSpec(
            num_scalar_prefetch=0,
            grid=(split, tiles_per_split),
            in_specs=[
                pl.BlockSpec((rows_per_tile, _LANES), in_index),
                pl.BlockSpec((rows_per_tile, _LANES), in_index),
            ],
            # Each split (core) owns a resident (8,128) accumulator block.
            out_specs=pl.BlockSpec((None, _SUB, _LANES), lambda c, i: (c, 0, 0)),
        ),
        compiler_params=pltpu.CompilerParams(
            dimension_semantics=("parallel", "arbitrary"),
            vmem_limit_bytes=int(vmem_limit),
        ),
        cost_estimate=cost,
    )(x2, t2)

    # Tiny final reduce (split*8*128 f32) + divide by batch size.
    return jnp.sum(partials) / jnp.float32(B)


if __name__ == "__main__":
    key = jax.random.PRNGKey(0)
    k1, k2 = jax.random.split(key)

    B, C = 8, 32
    # Probability-distribution inputs (the module logs them itself).
    inp = jax.nn.softmax(jax.random.normal(k1, (B, C), dtype=jnp.float32), axis=-1)
    tgt = jax.nn.softmax(jax.random.normal(k2, (B, C), dtype=jnp.float32), axis=-1)

    out = kldiv_loss(inp, tgt)
    jax.block_until_ready(out)

    # Pure-JAX reference check.
    ref_pointwise = jnp.where(tgt > 0, tgt * (jnp.log(tgt) - jnp.log(inp)), 0.0)
    ref = ref_pointwise.sum() / B
    assert jnp.allclose(out, ref, rtol=1e-5, atol=1e-6), (out, ref)

    print("KERNEL_OK")
</pallas_src>

<mosaic_0001>
module attributes {stable_mosaic.version = 11 : i64} {
  func.func @kernel(%arg0: i32, %arg1: i32, %arg2: memref<8x128xf32, #tpu.memory_space<vmem>>, %arg3: memref<8x128xf32, #tpu.memory_space<vmem>>, %arg4: memref<1x8x128xf32, #tpu.memory_space<vmem>>) attributes {dimension_semantics = [#tpu.dimension_semantics<parallel>, #tpu.dimension_semantics<arbitrary>], iteration_bounds = array<i64: 1, 1>, scalar_prefetch = 0 : i64, scratch_operands = 0 : i64, tpu.core_type = #tpu.core_type<tc>, window_params = [{transform_indices = @transform_0, window_bounds = array<i64: 8, 128>}, {transform_indices = @transform_1, window_bounds = array<i64: 8, 128>}, {transform_indices = @transform_2, window_bounds = array<i64: 1, 8, 128>}]} {
    %c0_i32 = arith.constant 0 : i32
    %0 = arith.cmpi eq, %arg1, %c0_i32 : i32
    %1 = arith.extui %0 : i1 to i32
    %c0_i32_0 = arith.constant 0 : i32
    %2 = arith.cmpi ne, %1, %c0_i32_0 : i32
    scf.if %2 {
      %cst_14 = arith.constant 0.000000e+00 : f32
      %31 = vector.broadcast %cst_14 : f32 to vector<8x128xf32>
      %c0_15 = arith.constant 0 : index
      %c0_16 = arith.constant 0 : index
      %c0_17 = arith.constant 0 : index
      %32 = vector.load %arg4[%c0_15, %c0_16, %c0_17] : memref<1x8x128xf32, #tpu.memory_space<vmem>>, vector<1x8x128xf32>
      %33 = vector.shape_cast %32 : vector<1x8x128xf32> to vector<8x128xf32>
      %34 = vector.shape_cast %31 : vector<8x128xf32> to vector<1x8x128xf32>
      tpu.vector_store %arg4[%c0_15, %c0_16, %c0_17], %34 {strides = array<i32>} : memref<1x8x128xf32, #tpu.memory_space<vmem>>, vector<1x8x128xf32>,
    } else {
    }
    %cst = arith.constant 0.000000e+00 : f32
    %3 = vector.broadcast %cst : f32 to vector<8x128xf32>
    %c0_i32_1 = arith.constant 0 : i32
    %c8_i32 = arith.constant 8 : i32
    %4 = arith.muli %c0_i32_1, %c8_i32 : i32
    %5 = tpu.assume_multiple %4, 8 : i32
    %6 = arith.index_cast %5 : i32 to index
    %c0 = arith.constant 0 : index
    %7 = vector.load %arg2[%6, %c0] : memref<8x128xf32, #tpu.memory_space<vmem>>, vector<8x128xf32>
    %8 = arith.index_cast %5 : i32 to index
    %c0_2 = arith.constant 0 : index
    %9 = vector.load %arg3[%8, %c0_2] : memref<8x128xf32, #tpu.memory_space<vmem>>, vector<8x128xf32>
    %cst_3 = arith.constant 0.000000e+00 : f32
    %10 = vector.broadcast %cst_3 : f32 to vector<8x128xf32>
    %11 = arith.cmpf ogt, %9, %10 : vector<8x128xf32>
    %cst_4 = arith.constant 1.000000e+00 : f32
    %12 = vector.broadcast %cst_4 : f32 to vector<8x128xf32>
    %13 = arith.select %11, %9, %12 : vector<8x128xi1>, vector<8x128xf32>
    %cst_5 = arith.constant 1.000000e+00 : f32
    %14 = vector.broadcast %cst_5 : f32 to vector<8x128xf32>
    %15 = arith.select %11, %7, %14 : vector<8x128xi1>, vector<8x128xf32>
    %16 = math.log %13 : vector<8x128xf32>
    %17 = math.log %15 : vector<8x128xf32>
    %18 = arith.subf %16, %17 : vector<8x128xf32>
    %19 = arith.mulf %13, %18 : vector<8x128xf32>
    %cst_6 = arith.constant 0.000000e+00 : f32
    %20 = vector.broadcast %cst_6 : f32 to vector<8x128xf32>
    %21 = arith.select %11, %19, %20 : vector<8x128xi1>, vector<8x128xf32>
    %22 = vector.shape_cast %21 : vector<8x128xf32> to vector<1x8x128xf32>
    %cst_7 = arith.constant dense<0.000000e+00> : vector<8x128xf32>
    %23 = vector.multi_reduction <add>, %22, %cst_7 [0] : vector<1x8x128xf32> to vector<8x128xf32>
    %24 = arith.addf %3, %23 : vector<8x128xf32>
    %c1_i32 = arith.constant 1 : i32
    %c0_8 = arith.constant 0 : index
    %c0_9 = arith.constant 0 : index
    %c0_10 = arith.constant 0 : index
    %25 = vector.load %arg4[%c0_8, %c0_9, %c0_10] : memref<1x8x128xf32, #tpu.memory_space<vmem>>, vector<1x8x128xf32>
    %26 = vector.shape_cast %25 : vector<1x8x128xf32> to vector<8x128xf32>
    %27 = arith.addf %26, %24 : vector<8x128xf32>
    %c0_11 = arith.constant 0 : index
    %c0_12 = arith.constant 0 : index
    %c0_13 = arith.constant 0 : index
    %28 = vector.load %arg4[%c0_11, %c0_12, %c0_13] : memref<1x8x128xf32, #tpu.memory_space<vmem>>, vector<1x8x128xf32>
    %29 = vector.shape_cast %28 : vector<1x8x128xf32> to vector<8x128xf32>
    %30 = vector.shape_cast %27 : vector<8x128xf32> to vector<1x8x128xf32>
    tpu.vector_store %arg4[%c0_11, %c0_12, %c0_13], %30 {strides = array<i32>} : memref<1x8x128xf32, #tpu.memory_space<vmem>>, vector<1x8x128xf32>,
    return
  }
  func.func @transform_0(%arg0: i32, %arg1: i32) -> (i32, i32) {
    %c1_i32 = arith.constant 1 : i32
    %0 = arith.muli %arg0, %c1_i32 : i32
    %1 = arith.addi %0, %arg1 : i32
    %c0_i32 = arith.constant 0 : i32
    %2 = arith.minsi %1, %c0_i32 : i32
    %c0_i32_0 = arith.constant 0 : i32
    %c0_i32_1 = arith.constant 0 : i32
    return %2, %c0_i32_0 : i32, i32
  }
  func.func @transform_1(%arg0: i32, %arg1: i32) -> (i32, i32) {
    %c1_i32 = arith.constant 1 : i32
    %0 = arith.muli %arg0, %c1_i32 : i32
    %1 = arith.addi %0, %arg1 : i32
    %c0_i32 = arith.constant 0 : i32
    %2 = arith.minsi %1, %c0_i32 : i32
    %c0_i32_0 = arith.constant 0 : i32
    %c0_i32_1 = arith.constant 0 : i32
    return %2, %c0_i32_0 : i32, i32
  }
  func.func @transform_2(%arg0: i32, %arg1: i32) -> (i32, i32, i32) {
    %c0_i32 = arith.constant 0 : i32
    %c0_i32_0 = arith.constant 0 : i32
    %c0_i32_1 = arith.constant 0 : i32
    return %arg0, %c0_i32, %c0_i32_0 : i32, i32, i32
  }
}

</mosaic_0001>

<bundles_post_ra>
// kernel: tpu_custom_call.1
= control target key start
LH: loop header
LB: loop body
LE: loop exit
PB: predicated region body
PF: predicated region fallthrough
CT: control target
= control target key end

     0   :  { %7 = vsyncpa [#allocation3], 0  ;;  %s228_s0 = inlined_call_operand.hbm [shape: f32[8,128], index: 0, kind: input, shape index: {}]   ;;  %s229_s1 = inlined_call_operand.hbm [shape: f32[8,128], index: 1, kind: input, shape index: {}]   ;;  %s230_s2 = inlined_call_operand.hbm [shape: f32[1,8,128], index: 2, kind: output, shape index: {}]  }
   0x1   :  { %8 = vsyncpa [#allocation6], 0 }
   0x2   :  { %9 = vsyncpa [#allocation4], 0  ;;  %s174_s9 = smov [#allocation2]   ;;  %s175_s11 = smov [#allocation5]  }
   0x3   :  { %s21_s10 = sshll.u32 %s174_s9, 4  ;;  %s36_s12 = sshll.u32 %s175_s11, 4  ;;  %s22_s10 = int_to_ptr.vmem [resolvable:$true] %s21_s10  ;;  %s37_s12 = int_to_ptr.vmem [resolvable:$true] %s36_s12 }
   0x4   :  { %s102_s15 = scalar_lea.hbm %s228_s0, 128 }
   0x5   :  { %p103_p0 = scmp.ne.s32.totalorder %s228_s0, %s102_s15  ;;  %p106_p1 = scmp.lt.u32.totalorder %s102_s15, %s228_s0 }
   0x7   :  { %p108_p2 = pnand %p106_p1, %p103_p0 }
   0x9   :  { %111 = shalt.err (!%p108_p2)
}
   0xa   :  { %s112_s20 = scalar_lea.vmem %s22_s10, 128  ;;  %p117_p4 = scmp.lt.s32.totalorder %s22_s10, %s22_s10 }
   0xb   :  { %p113_p3 = scmp.ne.s32.totalorder %s22_s10, %s112_s20  ;;  %p118_p5 = scmp.lt.s32.totalorder %s112_s20, %s112_s20 }
   0xd   :  { %p119_p6 = por %p118_p5, %p117_p4 }
   0xf   :  { %p120_p7 = pnand %p119_p6, %p113_p3 }
  0x11   :  { %123 = shalt.err (!%p120_p7)
}
  0x12   :  { %24 = dma.hbm_to_vmem [thread:$0]  %s228_s0, 128, %s22_s10, [#allocation3]  }
  0x13   :  { %s124_s25 = scalar_lea.hbm %s229_s1, 128 }
  0x14   :  { %p125_p8 = scmp.ne.s32.totalorder %s229_s1, %s124_s25  ;;  %p128_p9 = scmp.lt.u32.totalorder %s124_s25, %s229_s1 }
  0x16   :  { %p130_p10 = pnand %p128_p9, %p125_p8 }
  0x18   :  { %133 = shalt.err (!%p130_p10)
}
  0x19   :  { %s134_s30 = scalar_lea.vmem %s37_s12, 128  ;;  %p139_p12 = scmp.lt.s32.totalorder %s37_s12, %s37_s12 }
  0x1a   :  { %p135_p11 = scmp.ne.s32.totalorder %s37_s12, %s134_s30  ;;  %p140_p13 = scmp.lt.s32.totalorder %s134_s30, %s134_s30 }
  0x1c   :  { %p141_p0 = por %p140_p13, %p139_p12 }
  0x1e   :  { %p142_p1 = pnand %p141_p0, %p135_p11 }
  0x20   :  { %145 = shalt.err (!%p142_p1)
}
  0x21   :  { %39 = dma.hbm_to_vmem [thread:$0]  %s229_s1, 128, %s37_s12, [#allocation6]  }
  0x22   :  { %168 = dma.done.wait [#allocation3], 128  }
  0x23   :  { %169 = vsyncadd [#allocation3], 4294967168 }
  0x24   :  { %170 = dma.done.wait [#allocation6], 128  }
  0x25   :  { %171 = vsyncadd [#allocation6], 4294967168  ;;  %v57_v0 = vld [vmem:[#allocation2] sm:$0xff]  ;;  %v58_v1 = vld [vmem:[#allocation5] sm:$0xff]  ;;  %s176_s4 = smov [#allocation7]  }
  0x26   :  { %vm59_vm0 = vcmp.gt.f32.partialorder %v58_v1, 0.0  ;;  %s80_s5 = sshll.u32 %s176_s4, 4  ;;  %s81_s5 = int_to_ptr.vmem [resolvable:$true] %s80_s5 }
  0x27   :  { %v60_v2 = vsel %vm59_vm0, %v58_v1, 1.0  ;;  %v61_v3 = vsel %vm59_vm0, %v57_v0, 1.0  ;;  %s146_s1 = scalar_lea.vmem %s81_s5, 128  ;;  %p151_p3 = scmp.lt.s32.totalorder %s81_s5, %s81_s5 }
  0x28   :  { %98 = vlog2.f32 %v60_v2  ;;  %p147_p2 = scmp.ne.s32.totalorder %s81_s5, %s146_s1  ;;  %p152_p4 = scmp.lt.s32.totalorder %s146_s1, %s146_s1 }
  0x29   :  { %100 = vlog2.f32 %v61_v3 }
  0x2a   :  { %p153_p5 = por %p152_p4, %p151_p3 }
  0x2c   :  { %p154_p6 = pnand %p153_p5, %p147_p2 }
  0x32   :  { %v99_v4 = vpop.eup %98 }
  0x33   :  { %v101_v5 = vpop.eup %100  ;;  %v63_v6 = vmul.f32 0.6931472, %v99_v4 }
  0x34   :  { %v65_v7 = vmul.f32 0.6931472, %v101_v5 }
  0x36   :  { %v66_v8 = vsub.f32 %v63_v6, %v65_v7 }
  0x38   :  { %v67_v9 = vmul.f32 %v66_v8, %v60_v2 }
  0x3a   :  { %v68_v10 = vsel %vm59_vm0, %v67_v9, 0.0 }
  0x3b   :  { %73 = vst [vmem:[#allocation7] sm:$0xff] %v68_v10 }
  0x3c   :  { %157 = shalt.err (!%p154_p6)
}
  0x3d   :  { %s158_s8 = scalar_lea.hbm %s230_s2, 128 }
  0x3e   :  { %p159_p7 = scmp.ne.s32.totalorder %s230_s2, %s158_s8  ;;  %p162_p8 = scmp.lt.u32.totalorder %s158_s8, %s230_s2 }
  0x40   :  { %p164_p9 = pnand %p162_p8, %p159_p7 }
  0x42   :  { %167 = shalt.err (!%p164_p9)
}
  0x43   :  { %83 = dma.vmem_to_hbm [thread:$0]  %s81_s5, 128, %s230_s2, [#allocation4]  }
  0x44   :  { %172 = dma.done.wait [#allocation4], 128  }
  0x45   :  { %173 = vsyncadd [#allocation4], 4294967168 }
  0x46   :  { %87 = vsyncpa [#allocation3], 1 }
  0x47   :  { %88 = vsyncpa [#allocation6], 1 }
  0x48   :  { %89 = vsyncpa [#allocation4], 1 }

</bundles_post_ra>
